<compile_context>
chip_gen: v6e
topology: v6e:2x2x1
jax: 0.10.0
libtpu: 0.0.40
codegen_flags: <defaults>
</compile_context>

<pallas_src>
import functools

import jax
import jax.numpy as jnp
from jax.experimental import pallas as pl
from jax.experimental.pallas import tpu as pltpu


def _round_up(n, m):
    return ((n + m - 1) // m) * m


def _phase_shuffle_kernel(start_ref, x_ref, o_ref, *, T, Tpad, tb, max_shift):
    """One grid step = `tb` batch elements.

    start_ref : (B,) int32 in SMEM (scalar prefetch), start_b = shift_factor - k_b.
    x_ref     : (tb, C, Tpad) reflect+zero padded input block in VMEM.
    o_ref     : (tb, C, T) output block in VMEM.
    """
    b0 = pl.program_id(0) * tb
    nbits = max(1, max_shift.bit_length())

    for i in range(tb):                            # static unroll over the batch tile
        start = start_ref[b0 + i]                  # scalar shift in [0, max_shift]
        y = x_ref[i]                               # (C, Tpad)
        # Barrel shifter: circular left shift of y by `start` lanes built from
        # static rolls (shift = Tpad - amt is a left shift by amt).
        for bit in range(nbits):
            amt = 1 << bit
            rolled = pltpu.roll(y, shift=Tpad - amt, axis=1)
            bit_set = ((start >> bit) & 1) == 1
            y = jnp.where(bit_set, rolled, y)
        # Lanes [0, T) never wrap (start <= 2*shift_factor <= Tpad - T).
        o_ref[i] = y[:, :T]


def phase_shuffle(x, k, shift_factor, *, batch_tile_bytes=1 << 19):
    """Phase-shuffle x (B, C, T) along time by per-sample shifts k (B,) int32.

    k[b] must lie in [-shift_factor, shift_factor].  Passing a constant k
    vector reproduces batch_shuffle=True.
    """
    if shift_factor == 0:
        return x
    B, C, T = x.shape
    if not shift_factor < T:
        raise ValueError("shift_factor must be < T for single-reflection padding")
    s = int(shift_factor)
    start = (s - k.astype(jnp.int32)).astype(jnp.int32)     # in [0, 2*s]

    # Reflect-pad the time axis by s on both sides, then zero-pad up to a lane
    # multiple so the in-kernel slab is dense and 128-aligned.
    Tpad = _round_up(T + 2 * s, 128)
    xp = jnp.pad(x, ((0, 0), (0, 0), (s, s)), mode="reflect")
    if Tpad > T + 2 * s:
        xp = jnp.pad(xp, ((0, 0), (0, 0), (0, Tpad - (T + 2 * s))))

    # Batch tile: target ~batch_tile_bytes of traffic per grid step, keep at
    # least 2 grid steps (dual TensorCore on v7x), and divide B exactly.
    per_sample = C * (Tpad + T) * x.dtype.itemsize
    tb = max(1, min(B, batch_tile_bytes // max(per_sample, 1)))
    if B >= 2:
        tb = max(1, min(tb, B // 2))
    while B % tb:
        tb -= 1

    kernel = functools.partial(
        _phase_shuffle_kernel, T=T, Tpad=Tpad, tb=tb, max_shift=2 * s)

    grid_spec = pltpu.PrefetchScalarGridSpec(
        num_scalar_prefetch=1,
        grid=(B // tb,),
        in_specs=[pl.BlockSpec((tb, C, Tpad), lambda g, start_ref: (g, 0, 0))],
        out_specs=pl.BlockSpec((tb, C, T), lambda g, start_ref: (g, 0, 0)),
    )
    return pl.pallas_call(
        kernel,
        out_shape=jax.ShapeDtypeStruct((B, C, T), x.dtype),
        grid_spec=grid_spec,
        compiler_params=pltpu.CompilerParams(
            dimension_semantics=("parallel",)),
    )(start, xp)


def phase_shuffle_ref(x, k):
    """Pure-JAX reference (mirrors F.pad(..., mode='reflect') semantics)."""
    B, C, T = x.shape
    t = jnp.arange(T)

    def per_batch(xb, kb):
        idx = t - kb
        idx = jnp.where(idx < 0, -idx, idx)
        idx = jnp.where(idx > T - 1, 2 * (T - 1) - idx, idx)
        return xb[:, idx]

    return jax.vmap(per_batch)(x, k)


if __name__ == "__main__":
    key = jax.random.PRNGKey(0)
    shift_factor = 2

    # A small layer (T not 128-aligned) and a lane-aligned layer, both checked.
    for (B, C, T) in [(4, 8, 16), (4, 8, 256)]:
        key, kx, kk = jax.random.split(key, 3)
        x = jax.random.normal(kx, (B, C, T), dtype=jnp.float32)

        # per-sample shuffle (batch_shuffle=False): independent k per sample
        k_per_sample = jax.random.randint(kk, (B,), -shift_factor, shift_factor + 1)
        out = jax.block_until_ready(phase_shuffle(x, k_per_sample, shift_factor))
        ref = phase_shuffle_ref(x, k_per_sample)
        assert out.shape == x.shape
        assert jnp.allclose(out, ref), f"per-sample phase shuffle mismatch at {(B, C, T)}"

        # batch_shuffle=True: a single shift applied to the whole batch
        k_scalar = jnp.full((B,), -1, dtype=jnp.int32)
        out_b = jax.block_until_ready(phase_shuffle(x, k_scalar, shift_factor))
        ref_b = phase_shuffle_ref(x, k_scalar)
        assert jnp.allclose(out_b, ref_b), f"batch phase shuffle mismatch at {(B, C, T)}"

    print("KERNEL_OK")
</pallas_src>

<mosaic_0001>
module attributes {stable_mosaic.version = 11 : i64} {
  func.func @_phase_shuffle_kernel(%arg0: i32, %arg1: memref<4xi32, #tpu.memory_space<smem>>, %arg2: memref<2x8x128xf32, #tpu.memory_space<vmem>>, %arg3: memref<2x8x16xf32, #tpu.memory_space<vmem>>) attributes {dimension_semantics = [#tpu.dimension_semantics<parallel>], iteration_bounds = array<i64: 2>, scalar_prefetch = 1 : i64, scratch_operands = 0 : i64, tpu.core_type = #tpu.core_type<tc>, window_params = [{transform_indices = @transform_0, window_bounds = array<i64: 2, 8, 128>}, {transform_indices = @transform_1, window_bounds = array<i64: 2, 8, 16>}]} {
    %c2_i32 = arith.constant 2 : i32
    %0 = arith.muli %arg0, %c2_i32 : i32
    %c0_i32 = arith.constant 0 : i32
    %1 = arith.addi %0, %c0_i32 : i32
    %2 = arith.index_cast %1 : i32 to index
    %3 = memref.load %arg1[%2] : memref<4xi32, #tpu.memory_space<smem>>
    %c0 = arith.constant 0 : index
    %c0_0 = arith.constant 0 : index
    %c0_1 = arith.constant 0 : index
    %4 = vector.load %arg2[%c0, %c0_0, %c0_1] : memref<2x8x128xf32, #tpu.memory_space<vmem>>, vector<1x8x128xf32>
    %5 = vector.shape_cast %4 : vector<1x8x128xf32> to vector<8x128xf32>
    %c127_i32 = arith.constant 127 : i32
    %6 = tpu.dynamic_rotate %5 by %c127_i32 dim 1 : vector<8x128xf32>, i32 -> vector<8x128xf32>
    %c0_i32_2 = arith.constant 0 : i32
    %7 = arith.shrsi %3, %c0_i32_2 : i32
    %c1_i32 = arith.constant 1 : i32
    %8 = arith.andi %7, %c1_i32 : i32
    %c1_i32_3 = arith.constant 1 : i32
    %9 = arith.cmpi eq, %8, %c1_i32_3 : i32
    %10 = arith.select %9, %6, %5 : vector<8x128xf32>
    %c126_i32 = arith.constant 126 : i32
    %11 = tpu.dynamic_rotate %10 by %c126_i32 dim 1 : vector<8x128xf32>, i32 -> vector<8x128xf32>
    %c1_i32_4 = arith.constant 1 : i32
    %12 = arith.shrsi %3, %c1_i32_4 : i32
    %c1_i32_5 = arith.constant 1 : i32
    %13 = arith.andi %12, %c1_i32_5 : i32
    %c1_i32_6 = arith.constant 1 : i32
    %14 = arith.cmpi eq, %13, %c1_i32_6 : i32
    %15 = arith.select %14, %11, %10 : vector<8x128xf32>
    %c124_i32 = arith.constant 124 : i32
    %16 = tpu.dynamic_rotate %15 by %c124_i32 dim 1 : vector<8x128xf32>, i32 -> vector<8x128xf32>
    %c2_i32_7 = arith.constant 2 : i32
    %17 = arith.shrsi %3, %c2_i32_7 : i32
    %c1_i32_8 = arith.constant 1 : i32
    %18 = arith.andi %17, %c1_i32_8 : i32
    %c1_i32_9 = arith.constant 1 : i32
    %19 = arith.cmpi eq, %18, %c1_i32_9 : i32
    %20 = arith.select %19, %16, %15 : vector<8x128xf32>
    %21 = vector.extract_strided_slice %20 {offsets = [0, 0], sizes = [8, 16], strides = [1, 1]} : vector<8x128xf32> to vector<8x16xf32>
    %c0_10 = arith.constant 0 : index
    %c0_11 = arith.constant 0 : index
    %c0_12 = arith.constant 0 : index
    %22 = vector.load %arg3[%c0_10, %c0_11, %c0_12] : memref<2x8x16xf32, #tpu.memory_space<vmem>>, vector<1x8x16xf32>
    %23 = vector.shape_cast %22 : vector<1x8x16xf32> to vector<8x16xf32>
    %24 = vector.shape_cast %21 : vector<8x16xf32> to vector<1x8x16xf32>
    tpu.vector_store %arg3[%c0_10, %c0_11, %c0_12], %24 {strides = array<i32>} : memref<2x8x16xf32, #tpu.memory_space<vmem>>, vector<1x8x16xf32>,
    %c1_i32_13 = arith.constant 1 : i32
    %25 = arith.addi %0, %c1_i32_13 : i32
    %26 = arith.index_cast %25 : i32 to index
    %27 = memref.load %arg1[%26] : memref<4xi32, #tpu.memory_space<smem>>
    %c1 = arith.constant 1 : index
    %c0_14 = arith.constant 0 : index
    %c0_15 = arith.constant 0 : index
    %28 = vector.load %arg2[%c1, %c0_14, %c0_15] : memref<2x8x128xf32, #tpu.memory_space<vmem>>, vector<1x8x128xf32>
    %29 = vector.shape_cast %28 : vector<1x8x128xf32> to vector<8x128xf32>
    %c127_i32_16 = arith.constant 127 : i32
    %30 = tpu.dynamic_rotate %29 by %c127_i32_16 dim 1 : vector<8x128xf32>, i32 -> vector<8x128xf32>
    %c0_i32_17 = arith.constant 0 : i32
    %31 = arith.shrsi %27, %c0_i32_17 : i32
    %c1_i32_18 = arith.constant 1 : i32
    %32 = arith.andi %31, %c1_i32_18 : i32
    %c1_i32_19 = arith.constant 1 : i32
    %33 = arith.cmpi eq, %32, %c1_i32_19 : i32
    %34 = arith.select %33, %30, %29 : vector<8x128xf32>
    %c126_i32_20 = arith.constant 126 : i32
    %35 = tpu.dynamic_rotate %34 by %c126_i32_20 dim 1 : vector<8x128xf32>, i32 -> vector<8x128xf32>
    %c1_i32_21 = arith.constant 1 : i32
    %36 = arith.shrsi %27, %c1_i32_21 : i32
    %c1_i32_22 = arith.constant 1 : i32
    %37 = arith.andi %36, %c1_i32_22 : i32
    %c1_i32_23 = arith.constant 1 : i32
    %38 = arith.cmpi eq, %37, %c1_i32_23 : i32
    %39 = arith.select %38, %35, %34 : vector<8x128xf32>
    %c124_i32_24 = arith.constant 124 : i32
    %40 = tpu.dynamic_rotate %39 by %c124_i32_24 dim 1 : vector<8x128xf32>, i32 -> vector<8x128xf32>
    %c2_i32_25 = arith.constant 2 : i32
    %41 = arith.shrsi %27, %c2_i32_25 : i32
    %c1_i32_26 = arith.constant 1 : i32
    %42 = arith.andi %41, %c1_i32_26 : i32
    %c1_i32_27 = arith.constant 1 : i32
    %43 = arith.cmpi eq, %42, %c1_i32_27 : i32
    %44 = arith.select %43, %40, %39 : vector<8x128xf32>
    %45 = vector.extract_strided_slice %44 {offsets = [0, 0], sizes = [8, 16], strides = [1, 1]} : vector<8x128xf32> to vector<8x16xf32>
    %c1_28 = arith.constant 1 : index
    %c0_29 = arith.constant 0 : index
    %c0_30 = arith.constant 0 : index
    %46 = vector.load %arg3[%c1_28, %c0_29, %c0_30] : memref<2x8x16xf32, #tpu.memory_space<vmem>>, vector<1x8x16xf32>
    %47 = vector.shape_cast %46 : vector<1x8x16xf32> to vector<8x16xf32>
    %48 = vector.shape_cast %45 : vector<8x16xf32> to vector<1x8x16xf32>
    tpu.vector_store %arg3[%c1_28, %c0_29, %c0_30], %48 {strides = array<i32>} : memref<2x8x16xf32, #tpu.memory_space<vmem>>, vector<1x8x16xf32>,
    return
  }
  func.func @transform_0(%arg0: i32, %arg1: memref<4xi32, #tpu.memory_space<smem>>) -> (i32, i32, i32) {
    %c0_i32 = arith.constant 0 : i32
    %c0_i32_0 = arith.constant 0 : i32
    %c0_i32_1 = arith.constant 0 : i32
    return %arg0, %c0_i32, %c0_i32_0 : i32, i32, i32
  }
  func.func @transform_1(%arg0: i32, %arg1: memref<4xi32, #tpu.memory_space<smem>>) -> (i32, i32, i32) {
    %c0_i32 = arith.constant 0 : i32
    %c0_i32_0 = arith.constant 0 : i32
    %c0_i32_1 = arith.constant 0 : i32
    return %arg0, %c0_i32, %c0_i32_0 : i32, i32, i32
  }
}

</mosaic_0001>

<bundles_post_ra>
// kernel: tpu_custom_call.1
= control target key start
LH: loop header
LB: loop body
LE: loop exit
PB: predicated region body
PF: predicated region fallthrough
CT: control target
= control target key end

     0   :  { %s469_s9 = smov [#allocation3]   ;;  %s666_s0 = inlined_call_operand.hbm [shape: s32[4], index: 0, kind: input, shape index: {}]   ;;  %s667_s1 = inlined_call_operand.hbm [shape: f32[4,8,128], index: 1, kind: input, shape index: {}]   ;;  %s668_s2 = inlined_call_operand.hbm [shape: f32[4,8,16], index: 2, kind: output, shape index: {}]  }
   0x1   :  { %8 = dma.hbm_to_smem %s666_s0, 16, %s469_s9, [#allocation2] }
   0x2   :  { %443 = dma.done.wait [#allocation2], 16 }
   0x3   :  { %444 = vsyncadd [#allocation2], 4294967280 }
   0x4   :  { %10 = sfence }
   0x5   :  { %11 = vsyncpa [#allocation5], 0 }
   0x6   :  { %13 = vsyncpa [#allocation5 + $0x1], 0 }
   0x7   :  { %14 = vsyncpa [#allocation6], 0 }
   0x8   :  { %16 = vsyncpa [#allocation6 + $0x1], 0  ;;  %s497_s12 = smov 0   ;;  %s499_s13 = smov 0  }
   0x9   :  { %s501_s14 = smov 0   ;;  %s503_s15 = smov 0  }
   0xa LB: > { %s518_s0 = sadd.s32 4294967295, %s467_s15   ;;  %s292_s16 = sadd.s32 4294967294, %s467_s15   ;;  %s467_s15 = sphi %s503_s15, %s683_s15   ;;  %s463_s14 = sphi %s501_s14, %s682_s14   ;;  %s459_s13 = sphi %s499_s13, %s681_s13   ;;  %s455_s12 = sphi %s497_s12, %s680_s12  }
   0xb   : > { %s522_s17 = sadd.s32 1, %s467_s15   ;;  %s29_s18 = sadd.s32 1, %s463_s14 }
   0xc   : > { %s26_s19 = ssub.s32 %s467_s15, %s522_s17  ;;  %p36_p0 = scmp.ne.s32.totalorder %s463_s14, %s459_s13 }
   0xd   : > { %p27_p1 = scmp.eq.s32.totalorder %s26_s19, 0  ;;  %p37_p2 = scmp.eq.s32.totalorder %s467_s15, 0 }
   0xe   : > { %p42_p3 = scmp.ne.s32.totalorder %s459_s13, %s455_s12  ;;  %p43_p4 = scmp.eq.s32.totalorder %s518_s0, 0 }
   0xf   : > { %s534_s20 = scalar_select %p27_p1, %s463_s14, %s29_s18  }
  0x10   : > { %p536_p5 = por %p37_p2, %p36_p0  ;;  %p540_p6 = por %p43_p4, %p42_p3 }
  0x11   : > { %p66_p7 = scmp.eq.s32.totalorder %s518_s0, 1  ;;  %p72_p8 = scmp.eq.s32.totalorder %s292_s16, 1 }
  0x12   : > { %s672_s22 = scalar_select %p540_p6, 1, 0 }
  0x13   : > { %p323_p10 = scmp.lt.s32.totalorder %s467_s15, 2  ;;  %p547_p11 = por %p66_p7, %p36_p0 }
  0x14   : > { %p551_p12 = por %p72_p8, %p42_p3  ;;  %s92_s25 = sand.u32 1, %s463_s14  }
  0x15   : > { %s673_s23 = scalar_select %p547_p11, 1, 0 }
  0x16   : > { %s674_s24 = scalar_select %p551_p12, 1, 0 }
  0x17   : > { %s309_s26 = sshll.u32 %s467_s15, 8  ;;  %s295_s27 = sshll.u32 %s92_s25, 4 }
  0x18   : > { %s560_s30 = scalar_lea.hbm %s667_s1, %s309_s26  ;;  %s96_s3 = scalar_lea.vmem [#allocation4], %s295_s27 }
  0x19   : > { %s103_s4 = sshll.u32 %s96_s3, 4  ;;  %p564_p13 = pnand %p323_p10, %p536_p5  ;;  %s568_s4 = int_to_ptr.vmem [resolvable:$true] %s103_s4 }
  0x1a   : > { %s570_s6 = scalar_lea.sflag [#allocation5], %s92_s25  ;;  %s373_s7 = scalar_lea.hbm %s560_s30, 256 }
  0x1b   : > { %p374_p0 = scmp.ne.s32.totalorder %s560_s30, %s373_s7  ;;  %p375_p1 = pneg %p564_p13 }
  0x1c   : > { %s378_s10 = scalar_lea.hbm %s667_s1, 512  ;;  %p379_p4 = scmp.lt.s32.totalorder %s560_s30, %s667_s1 }
  0x1d   : > { %p376_p2 = pnand %p375_p1, %p374_p0  ;;  %p380_p5 = scmp.lt.s32.totalorder %s378_s10, %s373_s7 }
  0x1f   : > { %p377_p3 = pneg %p376_p2  ;;  %p381_p7 = por %p380_p5, %p379_p4 }
  0x21   : > { %p382_p8 = pnand %p381_p7, %p377_p3 }
  0x23   : > { %385 = shalt.err (!%p382_p8)
}
  0x24   : > { %s386_s18 = scalar_lea.vmem %s568_s4, 256  ;;  %s470_s19 = smov [#allocation4]  }
  0x25   : > { %p387_p10 = scmp.ne.s32.totalorder %s568_s4, %s386_s18  ;;  %s391_s21 = sshll.u32 %s470_s19, 4  ;;  %s392_s21 = int_to_ptr.vmem [resolvable:$false] %s391_s21 }
  0x26   : > { %s393_s25 = scalar_lea.vmem %s392_s21, 512  ;;  %p394_p2 = scmp.lt.s32.totalorder %s568_s4, %s392_s21 }
  0x27   : > { %p389_p9 = pnand %p387_p10, %p375_p1  ;;  %p395_p12 = scmp.lt.s32.totalorder %s393_s25, %s386_s18 }
  0x29   : > { %p390_p0 = pneg %p389_p9  ;;  %p396_p11 = por %p395_p12, %p394_p2 }
  0x2b   : > { %p397_p6 = pnand %p396_p11, %p390_p0 }
  0x2d   : > { %400 = shalt.err (!%p397_p6)
}
  0x2e   : > { %s471_s26 = smov 128   ;;  %s472_s27 = smov 8  }
  0x2f   : > { %318 = dma.hbm_to_vmem [thread:$0]  (!%p564_p13), %s560_s30, 256, %s568_s4, %s570_s6, %s471_s26, %s471_s26, %s472_s27  }
  0x30   : > { %p298_p9 = scmp.ge.s32.totalorder %s467_s15, 1  ;;  %p111_p1 = scmp.lt.s32.totalorder %s467_s15, 3 }
  0x32   : > { %p112_p3 = pnand %p298_p9, %p111_p1 }
  0x33   : > { %s594_s28 = sand.u32 (!%p112_p3), 1, %s459_s13   ;;  %p676_p6 = scmp.ne.s32.totalorder (!%p112_p3), %s672_s22, 0 }
  0x34   : > { %115 = sbr.rel (%p112_p3) target bundleno = 425 (0x1a9), region = 24  ;;  %s299_s29 = sshll.u32 (!%p112_p3), %s594_s28, 4 }
  0x35   : > { %s118_s3 = scalar_lea.sflag (!%p112_p3), [#allocation5], %s594_s28  ;;  %s121_s7 = scalar_lea.vmem (!%p112_p3), [#allocation4], %s299_s29 }
  0x39   : > { %446 = dma.done.wait (%p676_p6), %s118_s3, 256  }
  0x3a   : > { %448 = vsyncadd (%p676_p6), %s118_s3, 4294967040  ;;  %v144_v0 = vld [vmem:[%s121_s7] sm:$0xff]  ;;  %s473_s30 = smov 127   ;;  %v302_v1 = vld [vmem:[%s121_s7 + $0x8] sm:$0xff]  ;;  %s301_s4 = sshll.u32 %s518_s0, 1  ;;  %vm171_vm5 = vcmask 130048  }
  0x3b   : > { %145 = vrot.lane.b32.xlu0 %v144_v0, %s473_s30  ;;  %s605_s5 = sld [smem:[#allocation3 + %s301_s4]]  ;;  %s173_s6 = sadd.s32 1, %s301_s4 }
  0x3c   : > { %s607_s8 = sld [smem:[#allocation3 + %s173_s6]]  ;;  %s474_s10 = smov 126  }
  0x3d   : > { %s475_s21 = smov 124   ;;  %s139_s7 = scalar_lea.vmem [#allocation7], %s299_s29 }
  0x3e   : > { %s310_s4 = sshll.u32 %s518_s0, 8  ;;  %s206_s29 = scalar_lea.sflag [#allocation6], %s594_s28 }
  0x3f   : > { %177 = vrot.lane.b32.xlu0 %v302_v1, %s473_s30  ;;  %s219_s30 = sshll.u32 %s139_s7, 4  ;;  %p677_p12 = scmp.ne.s32.totalorder %s673_s23, 0  ;;  %s618_s30 = int_to_ptr.vmem [resolvable:$true] %s219_s30 }
  0x40   : > { %s476_s0 = smov [#allocation7]  }
  0x41   : > { %s147_s9 = sand.u32 1, %s605_s5  ;;  %s155_s11 = sshra.s32 %s605_s5, 1 }
  0x42   : > { %v150_v2 = vstv %s147_s9  ;;  %s179_s22 = sand.u32 1, %s607_s8  ;;  %s156_s16 = sand.u32 1, %s155_s11 }
  0x43   : > { %vm151_vm0 = vcmp.eq.s32.totalorder %v150_v2, 1  ;;  %v182_v3 = vstv %s179_s22  ;;  %s187_s18 = sshra.s32 %s607_s8, 1  ;;  %v159_v8 = vstv %s156_s16  ;;  %s164_s25 = sshra.s32 %s605_s5, 2 }
  0x44   : > { %vm183_vm1 = vcmp.eq.s32.totalorder %v182_v3, 1  ;;  %s188_s19 = sand.u32 1, %s187_s18  ;;  %vm160_vm2 = vcmp.eq.s32.totalorder %v159_v8, 1  ;;  %s165_s26 = sand.u32 1, %s164_s25 }
  0x45   : > { %v191_v9 = vstv %s188_s19  ;;  %s196_s27 = sshra.s32 %s607_s8, 2  ;;  %v168_v14 = vstv %s165_s26  ;;  %s623_s8 = scalar_lea.hbm %s668_s2, %s310_s4 }
  0x46   : > { %vm192_vm3 = vcmp.eq.s32.totalorder %v191_v9, 1  ;;  %s197_s3 = sand.u32 1, %s196_s27  ;;  %vm169_vm4 = vcmp.eq.s32.totalorder %v168_v14, 1  ;;  %s401_s9 = scalar_lea.vmem %s618_s30, 256 }
  0x47   : > { %v200_v15 = vstv %s197_s3  ;;  %p402_p11 = scmp.ne.s32.totalorder %s618_s30, %s401_s9  ;;  %s405_s22 = sshll.u32 %s476_s0, 4  ;;  %s406_s22 = int_to_ptr.vmem [resolvable:$false] %s405_s22 }
  0x48   : > { %vm201_vm6 = vcmp.eq.s32.totalorder %v200_v15, 1  ;;  %p408_p5 = scmp.lt.s32.totalorder %s618_s30, %s406_s22 }
  0x49   : > { %p403_p13 = pnand %p402_p11, %p677_p12 }
  0x4b   : > { %p404_p4 = pneg %p403_p13 }
  0xad   : > { %v146_v4 = vpop.permute.xlu0 %145 }
  0xae   : > { %v152_v5 = vsel %vm151_vm0, %v146_v4, %v144_v0 }
  0xaf   : > { %153 = vrot.lane.b32.xlu1 %v152_v5, %s474_s10 }
  0xb1   : > { %v178_v6 = vpop.permute.xlu0 %177 }
  0xb2   : > { %v184_v7 = vsel %vm183_vm1, %v178_v6, %v302_v1 }
  0xb3   : > { %185 = vrot.lane.b32.xlu1 %v184_v7, %s474_s10  ;;  %s407_s10 = scalar_lea.vmem %s406_s22, 512 }
  0xb4   : > { %p409_p7 = scmp.lt.s32.totalorder %s407_s10, %s401_s9 }
  0xb6   : > { %p410_p8 = por %p409_p7, %p408_p5 }
  0xb8   : > { %p411_p10 = pnand %p410_p8, %p404_p4 }
 0x121   : > { %v154_v10 = vpop.permute.xlu1 %153 }
 0x122   : > { %v161_v11 = vsel %vm160_vm2, %v154_v10, %v152_v5 }
 0x123   : > { %162 = vrot.lane.b32.xlu0 %v161_v11, %s475_s21 }
 0x125   : > { %v186_v12 = vpop.permute.xlu1 %185 }
 0x126   : > { %v193_v13 = vsel %vm192_vm3, %v186_v12, %v184_v7 }
 0x127   : > { %194 = vrot.lane.b32.xlu1 %v193_v13, %s475_s21 }
 0x195   : > { %v163_v16 = vpop.permute.xlu0 %162 }
 0x196   : > { %v170_v17 = vsel %vm169_vm4, %v163_v16, %v161_v11 }
 0x197   : > { %172 = vst.msk [vmem:[%s139_s7] sm:$0xff] %vm171_vm5, %v170_v17 }
 0x199   : > { %v195_v18 = vpop.permute.xlu1 %194 }
 0x19a   : > { %v202_v19 = vsel %vm201_vm6, %v195_v18, %v193_v13 }
 0x19b   : > { %303 = vst.msk [vmem:[%s139_s7 + $0x8] sm:$0xff] %vm171_vm5, %v202_v19 }
 0x19c   : > { %414 = shalt.err (!%p411_p10)
}
 0x19d   : > { %s415_s11 = scalar_lea.hbm %s623_s8, 256  ;;  %s419_s19 = scalar_lea.hbm %s668_s2, 512 }
 0x19e   : > { %p416_p0 = scmp.ne.s32.totalorder %s623_s8, %s415_s11  ;;  %p420_p1 = scmp.lt.s32.totalorder %s623_s8, %s668_s2 }
 0x19f   : > { %p421_p3 = scmp.lt.s32.totalorder %s419_s19, %s415_s11 }
 0x1a0   : > { %p417_p2 = pnand %p416_p0, %p677_p12 }
 0x1a1   : > { %p422_p6 = por %p421_p3, %p420_p1 }
 0x1a2   : > { %p418_p9 = pneg %p417_p2 }
 0x1a4   : > { %p423_p11 = pnand %p422_p6, %p418_p9 }
 0x1a6   : > { %426 = shalt.err (!%p423_p11)
}
 0x1a7   : > { %s477_s26 = smov 128   ;;  %s478_s27 = smov 8  }
 0x1a8   : > { %313 = dma.vmem_to_hbm [thread:$0]  (%p677_p12), %s618_s30, 256, %s623_s8, %s206_s29, %s477_s26, %s477_s26, %s478_s27  }
 0x1a9 PF: > { %s234_s3 = sand.u32 1, %s455_s12   ;;  %p678_p13 = scmp.ne.s32.totalorder %s674_s24, 0 }
 0x1aa   : > { %p679_p4 = scmp.ge.s32.totalorder %s467_s15, 2  ;;  %s235_s7 = scalar_lea.sflag [#allocation6], %s234_s3 }
 0x1ac   : > { %p320_p5 = pnand %p679_p4, %p678_p13 }
 0x1ae   : > { %p321_p7 = pneg %p320_p5 }
 0x1b0   : > { %450 = dma.done.wait (%p321_p7), %s235_s7, 256  }
 0x1b1   : > { %452 = vsyncadd (%p321_p7), %s235_s7, 4294967040  ;;  %p19_p8 = scmp.ge.s32.totalorder %s522_s17, 4   ;;  %s680_s12 = smov %s459_s13 }
 0x1b2   : > { %s681_s13 = smov %s463_s14  ;;  %s682_s14 = smov %s534_s20 }
 0x1b3   : > { %s683_s15 = smov %s522_s17  ;;  %21 = sbr.rel (!%p19_p8) target bundleno = 10 (0xa), region = 71 }
 0x1b8   :  { %240 = vsyncpa [#allocation5], 1 }
 0x1b9   :  { %242 = vsyncpa [#allocation5 + $0x1], 1 }
 0x1ba   :  { %243 = vsyncpa [#allocation6], 1 }
 0x1bb   :  { %245 = vsyncpa [#allocation6 + $0x1], 1 }

</bundles_post_ra>
